<compile_context>
chip_gen: v6e
topology: v6e:2x2x1
jax: 0.10.0
libtpu: 0.0.40
codegen_flags: <defaults>
</compile_context>

<pallas_src>
import jax
import jax.numpy as jnp
import numpy as np
from jax import lax
from jax.experimental import pallas as pl
from jax.experimental.pallas import tpu as pltpu

_F_PAD = 8        # feature dim (7) padded to 8
_T_TGT = 128      # target tile size (lane axis)
_OUT_LANES = 128  # lane-dense output width


def _smooth_l1(d):
    ad = jnp.abs(d)
    return jnp.where(ad < 1.0, 0.5 * ad * ad, ad - 0.5)


def _make_kernel(n_pred, tile_p):
    def kernel(p_ref, tf_ref, tr_ref, out_ref, box_sc):
        i = pl.program_id(0)          # prediction tile
        j = pl.program_id(1)          # target tile
        n_tj = pl.num_programs(1)

        # reset the per-pred-tile carry at the first target tile
        @pl.when(j == 0)
        def _():
            box_sc[...] = jnp.zeros_like(box_sc)

        p = p_ref[...]     # (tile_p, 8)   predictions, row-major
        tf = tf_ref[...]   # (8, 128)      targets, feature-major
        tr = tr_ref[...]   # (128, 8)      targets, row-major (box coords + flag lane)

        px1 = p[:, 0:1]; py1 = p[:, 1:2]; px2 = p[:, 2:3]; py2 = p[:, 3:4]
        pcls = p[:, 6:7]
        tx1 = tf[0:1, :]; ty1 = tf[1:2, :]; tx2 = tf[2:3, :]; ty2 = tf[3:4, :]
        tcls = tf[6:7, :]

        # ---- pairwise intersection / areas (+1 pixel convention) ----
        xA = jnp.maximum(px1, tx1)
        yA = jnp.maximum(py1, ty1)
        xB = jnp.minimum(px2, tx2)
        yB = jnp.minimum(py2, ty2)
        inter = jnp.maximum(0.0, xB - xA + 1.0) * jnp.maximum(0.0, yB - yA + 1.0)
        areaA = (px2 - px1 + 1.0) * (py2 - py1 + 1.0)          # (tile_p, 1)
        areaB = (tx2 - tx1 + 1.0) * (ty2 - ty1 + 1.0)          # (1, 128)
        # iou > 0.5  <=>  2*inter > areaA + areaB - inter  (no divide, no 0/0)
        iou_ok = (2.0 * inter) > (areaA + areaB - inter)       # (tile_p, 128)

        # padded target columns have class = NaN -> compare is always False
        valid = iou_ok & (pcls == tcls)                        # (tile_p, 128)

        # FIRST matching target within this tile = min valid column index
        col_id = lax.broadcasted_iota(jnp.int32, (tile_p, _T_TGT), 1)
        big_i = jnp.int32(_T_TGT + 1)
        cand = jnp.where(valid, col_id, big_i)
        first_idx = jnp.min(cand, axis=1, keepdims=True)       # (tile_p, 1)
        first_mask = (col_id == first_idx)                     # one-hot (or all-false)

        # gather matched target box + match flag on the MXU:
        # (tile_p,128)@(128,8)->(tile_p,8); lane 4 of tr is 1.0 for real targets,
        # so gathered[:, 4] == 1.0 exactly when this tile produced a match.
        gathered = jnp.dot(first_mask.astype(jnp.float32), tr,
                           preferred_element_type=jnp.float32)

        prev = box_sc[...]                                     # (tile_p, 8)
        new_match = (gathered[:, 4:5] > 0.5) & (prev[:, 4:5] < 0.5)
        box_sc[...] = jnp.where(new_match, gathered, prev)

        # ---- finalize on the last target tile ----
        @pl.when(j == n_tj - 1)
        def _():
            carry = box_sc[...]                                # (tile_p, 8)
            lane = lax.broadcasted_iota(jnp.int32, (tile_p, _F_PAD), 1)
            diff = jnp.where(lane < 4, p - carry, 0.0)         # box coords only
            reg = jnp.sum(_smooth_l1(diff), axis=1, keepdims=True) * 0.25  # mean of 4

            pconf = p[:, 4:5]
            matched = carry[:, 4:5] > 0.5
            per_pred = jnp.where(matched, reg - jnp.log(pconf),
                                 -jnp.log(1.0 - pconf))

            row_id = lax.broadcasted_iota(jnp.int32, (tile_p, 1), 0)
            pred_ok = (i * tile_p + row_id) < n_pred
            per_pred = jnp.where(pred_ok, per_pred, 0.0)       # drop padded rows

            tile_sum = jnp.sum(per_pred)
            out_ref[...] = jnp.full((1, 8, _OUT_LANES), tile_sum, dtype=jnp.float32)

    return kernel


def fusion_loss_pallas(preds, targets, *, max_tile_p=512):
    """preds: (1, N, 7) float32, targets: (M, 7) float32 -> scalar f32 loss."""
    p = jnp.asarray(preds, jnp.float32)[0]
    t = jnp.asarray(targets, jnp.float32)
    n_pred, f = p.shape
    n_tgt = t.shape[0]

    def rup(x, m):
        return ((x + m - 1) // m) * m

    # tile_p capped at 512 rows: the live (tile_p,128) f32 intermediates stay far
    # under v7x's 32 MiB scoped VMEM while still amortizing per-step overhead.
    tile_p = min(max_tile_p, max(8, rup(n_pred, 8)))
    n_pred_pad = rup(max(n_pred, 1), tile_p)
    n_tgt_pad = rup(max(n_tgt, 1), _T_TGT)
    n_pt = n_pred_pad // tile_p
    n_tt = n_tgt_pad // _T_TGT

    p_pad = jnp.zeros((n_pred_pad, _F_PAD), jnp.float32).at[:n_pred, :f].set(p)

    # feature-major targets (pairwise IoU broadcasting along lanes);
    # class row is NaN for padded columns so they can never match.
    t_fm = jnp.zeros((_F_PAD, n_tgt_pad), jnp.float32)
    t_fm = t_fm.at[6, :].set(jnp.nan)
    t_fm = t_fm.at[:f, :n_tgt].set(t.T)

    # row-major targets for the MXU gather: box coords in lanes 0..3,
    # a 1.0 "real target" flag in lane 4, zeros elsewhere.
    t_rm = jnp.zeros((n_tgt_pad, _F_PAD), jnp.float32)
    t_rm = t_rm.at[:n_tgt, :4].set(t[:, :4])
    t_rm = t_rm.at[:n_tgt, 4].set(1.0)

    kernel = _make_kernel(n_pred, tile_p)
    out = pl.pallas_call(
        kernel,
        out_shape=jax.ShapeDtypeStruct((n_pt, 8, _OUT_LANES), jnp.float32),
        grid_spec=pltpu.PrefetchScalarGridSpec(
            num_scalar_prefetch=0,
            grid=(n_pt, n_tt),
            in_specs=[
                pl.BlockSpec((tile_p, _F_PAD), lambda i, j: (i, 0)),
                pl.BlockSpec((_F_PAD, _T_TGT), lambda i, j: (0, j)),
                pl.BlockSpec((_T_TGT, _F_PAD), lambda i, j: (j, 0)),
            ],
            out_specs=pl.BlockSpec((1, 8, _OUT_LANES), lambda i, j: (i, 0, 0)),
            scratch_shapes=[
                pltpu.VMEM((tile_p, _F_PAD), jnp.float32),  # matched box + flag carry
            ],
        ),
        compiler_params=pltpu.CompilerParams(
            dimension_semantics=("parallel", "arbitrary")),
    )(p_pad, t_fm, t_rm)
    # per-pred-tile partial sums -> scalar
    return jnp.sum(out[:, 0, 0])


# ---------------- pure-numpy reference (mirrors the torch code) ----------------
def _bb_iou(boxA, boxB):
    xA = max(boxA[0], boxB[0]); yA = max(boxA[1], boxB[1])
    xB = min(boxA[2], boxB[2]); yB = min(boxA[3], boxB[3])
    inter = max(0.0, xB - xA + 1.0) * max(0.0, yB - yA + 1.0)
    areaA = (boxA[2] - boxA[0] + 1.0) * (boxA[3] - boxA[1] + 1.0)
    areaB = (boxB[2] - boxB[0] + 1.0) * (boxB[3] - boxB[1] + 1.0)
    return inter / float(areaA + areaB - inter)


def fusion_loss_ref(preds, targets):
    preds = np.asarray(preds, np.float32)[0]
    targets = np.asarray(targets, np.float32)
    loss = 0.0
    for pred in preds:
        matched = False
        for tgt in targets:
            iou = _bb_iou(pred[0:4], tgt[0:4])
            if iou > 0.5 and pred[6] == tgt[6]:
                matched = True
                d = pred[0:4] - tgt[0:4]
                ad = np.abs(d)
                sl1 = float(np.mean(np.where(ad < 1.0, 0.5 * ad * ad, ad - 0.5)))
                loss += sl1 + (-np.log(float(pred[4])))
                break
        if not matched:
            loss += -np.log(1.0 - float(pred[4]))
    return np.float32(loss)


if __name__ == "__main__":
    key = jax.random.PRNGKey(0)
    k1, k2, k3, k4, k5, k6 = jax.random.split(key, 6)

    M, N = 4, 6  # targets, predictions

    # Build targets: [x1, y1, x2, y2, score, extra, cls]
    xy = jax.random.uniform(k1, (M, 2), minval=0.0, maxval=20.0)
    wh = jax.random.uniform(k2, (M, 2), minval=5.0, maxval=15.0)
    t_cls = jax.random.randint(k3, (M,), 0, 3).astype(jnp.float32)
    targets = jnp.concatenate(
        [xy, xy + wh, jnp.ones((M, 1)), jnp.zeros((M, 1)), t_cls[:, None]], axis=1
    )

    # Predictions: first 3 closely overlap targets 0..2 (same class -> matches),
    # last 3 are far away (unmatched branch).
    noise = jax.random.uniform(k4, (3, 4), minval=-0.5, maxval=0.5)
    matched_boxes = targets[:3, 0:4] + noise
    far_xy = jax.random.uniform(k5, (3, 2), minval=100.0, maxval=120.0)
    far_boxes = jnp.concatenate([far_xy, far_xy + 8.0], axis=1)
    conf = jax.random.uniform(k6, (N, 1), minval=0.2, maxval=0.8)
    p_cls = jnp.concatenate(
        [t_cls[:3], jax.random.randint(k3, (3,), 0, 3).astype(jnp.float32)]
    )
    preds_rows = jnp.concatenate(
        [jnp.concatenate([matched_boxes, far_boxes], axis=0),
         conf, jnp.zeros((N, 1)), p_cls[:, None]], axis=1
    )
    preds = preds_rows[None, :, :]  # (1, N, 7) — forward does preds = preds[0]

    out = fusion_loss_pallas(preds, targets)
    out = jax.block_until_ready(out)

    ref = fusion_loss_ref(np.asarray(preds), np.asarray(targets))
    np.testing.assert_allclose(np.asarray(out), ref, rtol=1e-3, atol=1e-3)

    print("KERNEL_OK")
</pallas_src>

<mosaic_0001>
module attributes {stable_mosaic.version = 11 : i64} {
  func.func @kernel(%arg0: i32, %arg1: i32, %arg2: memref<8x8xf32, #tpu.memory_space<vmem>>, %arg3: memref<8x128xf32, #tpu.memory_space<vmem>>, %arg4: memref<128x8xf32, #tpu.memory_space<vmem>>, %arg5: memref<1x8x128xf32, #tpu.memory_space<vmem>>, %arg6: memref<8x8xf32, #tpu.memory_space<vmem>>) attributes {dimension_semantics = [#tpu.dimension_semantics<parallel>, #tpu.dimension_semantics<arbitrary>], iteration_bounds = array<i64: 1, 1>, scalar_prefetch = 0 : i64, scratch_operands = 1 : i64, tpu.core_type = #tpu.core_type<tc>, window_params = [{transform_indices = @transform_0, window_bounds = array<i64: 8, 8>}, {transform_indices = @transform_1, window_bounds = array<i64: 8, 128>}, {transform_indices = @transform_2, window_bounds = array<i64: 128, 8>}, {transform_indices = @transform_3, window_bounds = array<i64: 1, 8, 128>}]} {
    %c0_i32 = arith.constant 0 : i32
    %0 = arith.cmpi eq, %arg1, %c0_i32 : i32
    %1 = arith.extui %0 : i1 to i32
    %c0_i32_0 = arith.constant 0 : i32
    %2 = arith.cmpi ne, %1, %c0_i32_0 : i32
    scf.if %2 {
      %cst_24 = arith.constant 0.000000e+00 : f32
      %89 = vector.broadcast %cst_24 : f32 to vector<8x8xf32>
      %c0_25 = arith.constant 0 : index
      %c0_26 = arith.constant 0 : index
      %90 = vector.load %arg6[%c0_25, %c0_26] : memref<8x8xf32, #tpu.memory_space<vmem>>, vector<8x8xf32>
      tpu.vector_store %arg6[%c0_25, %c0_26], %89 {strides = array<i32>} : memref<8x8xf32, #tpu.memory_space<vmem>>, vector<8x8xf32>,
    } else {
    }
    %c0 = arith.constant 0 : index
    %c0_1 = arith.constant 0 : index
    %3 = vector.load %arg2[%c0, %c0_1] : memref<8x8xf32, #tpu.memory_space<vmem>>, vector<8x8xf32>
    %c0_2 = arith.constant 0 : index
    %c0_3 = arith.constant 0 : index
    %4 = vector.load %arg3[%c0_2, %c0_3] : memref<8x128xf32, #tpu.memory_space<vmem>>, vector<8x128xf32>
    %c0_4 = arith.constant 0 : index
    %c0_5 = arith.constant 0 : index
    %5 = vector.load %arg4[%c0_4, %c0_5] : memref<128x8xf32, #tpu.memory_space<vmem>>, vector<128x8xf32>
    %6 = vector.extract_strided_slice %3 {offsets = [0, 0], sizes = [8, 1], strides = [1, 1]} : vector<8x8xf32> to vector<8x1xf32>
    %7 = vector.extract_strided_slice %3 {offsets = [0, 1], sizes = [8, 1], strides = [1, 1]} : vector<8x8xf32> to vector<8x1xf32>
    %8 = vector.extract_strided_slice %3 {offsets = [0, 2], sizes = [8, 1], strides = [1, 1]} : vector<8x8xf32> to vector<8x1xf32>
    %9 = vector.extract_strided_slice %3 {offsets = [0, 3], sizes = [8, 1], strides = [1, 1]} : vector<8x8xf32> to vector<8x1xf32>
    %10 = vector.extract_strided_slice %3 {offsets = [0, 6], sizes = [8, 1], strides = [1, 1]} : vector<8x8xf32> to vector<8x1xf32>
    %11 = vector.extract_strided_slice %4 {offsets = [0, 0], sizes = [1, 128], strides = [1, 1]} : vector<8x128xf32> to vector<1x128xf32>
    %12 = vector.extract_strided_slice %4 {offsets = [1, 0], sizes = [1, 128], strides = [1, 1]} : vector<8x128xf32> to vector<1x128xf32>
    %13 = vector.extract_strided_slice %4 {offsets = [2, 0], sizes = [1, 128], strides = [1, 1]} : vector<8x128xf32> to vector<1x128xf32>
    %14 = vector.extract_strided_slice %4 {offsets = [3, 0], sizes = [1, 128], strides = [1, 1]} : vector<8x128xf32> to vector<1x128xf32>
    %15 = vector.extract_strided_slice %4 {offsets = [6, 0], sizes = [1, 128], strides = [1, 1]} : vector<8x128xf32> to vector<1x128xf32>
    %16 = vector.broadcast %6 : vector<8x1xf32> to vector<8x128xf32>
    %17 = vector.broadcast %11 : vector<1x128xf32> to vector<8x128xf32>
    %18 = arith.maximumf %16, %17 : vector<8x128xf32>
    %19 = vector.broadcast %7 : vector<8x1xf32> to vector<8x128xf32>
    %20 = vector.broadcast %12 : vector<1x128xf32> to vector<8x128xf32>
    %21 = arith.maximumf %19, %20 : vector<8x128xf32>
    %22 = vector.broadcast %8 : vector<8x1xf32> to vector<8x128xf32>
    %23 = vector.broadcast %13 : vector<1x128xf32> to vector<8x128xf32>
    %24 = arith.minimumf %22, %23 : vector<8x128xf32>
    %25 = vector.broadcast %9 : vector<8x1xf32> to vector<8x128xf32>
    %26 = vector.broadcast %14 : vector<1x128xf32> to vector<8x128xf32>
    %27 = arith.minimumf %25, %26 : vector<8x128xf32>
    %28 = arith.subf %24, %18 : vector<8x128xf32>
    %cst = arith.constant 1.000000e+00 : f32
    %29 = vector.broadcast %cst : f32 to vector<8x128xf32>
    %30 = arith.addf %28, %29 : vector<8x128xf32>
    %cst_6 = arith.constant 0.000000e+00 : f32
    %31 = vector.broadcast %cst_6 : f32 to vector<8x128xf32>
    %32 = arith.maximumf %31, %30 : vector<8x128xf32>
    %33 = arith.subf %27, %21 : vector<8x128xf32>
    %cst_7 = arith.constant 1.000000e+00 : f32
    %34 = vector.broadcast %cst_7 : f32 to vector<8x128xf32>
    %35 = arith.addf %33, %34 : vector<8x128xf32>
    %cst_8 = arith.constant 0.000000e+00 : f32
    %36 = vector.broadcast %cst_8 : f32 to vector<8x128xf32>
    %37 = arith.maximumf %36, %35 : vector<8x128xf32>
    %38 = arith.mulf %32, %37 : vector<8x128xf32>
    %39 = arith.subf %8, %6 : vector<8x1xf32>
    %cst_9 = arith.constant 1.000000e+00 : f32
    %40 = vector.broadcast %cst_9 : f32 to vector<8x1xf32>
    %41 = arith.addf %39, %40 : vector<8x1xf32>
    %42 = arith.subf %9, %7 : vector<8x1xf32>
    %cst_10 = arith.constant 1.000000e+00 : f32
    %43 = vector.broadcast %cst_10 : f32 to vector<8x1xf32>
    %44 = arith.addf %42, %43 : vector<8x1xf32>
    %45 = arith.mulf %41, %44 : vector<8x1xf32>
    %46 = arith.subf %13, %11 : vector<1x128xf32>
    %cst_11 = arith.constant 1.000000e+00 : f32
    %47 = vector.broadcast %cst_11 : f32 to vector<1x128xf32>
    %48 = arith.addf %46, %47 : vector<1x128xf32>
    %49 = arith.subf %14, %12 : vector<1x128xf32>
    %cst_12 = arith.constant 1.000000e+00 : f32
    %50 = vector.broadcast %cst_12 : f32 to vector<1x128xf32>
    %51 = arith.addf %49, %50 : vector<1x128xf32>
    %52 = arith.mulf %48, %51 : vector<1x128xf32>
    %cst_13 = arith.constant 2.000000e+00 : f32
    %53 = vector.broadcast %cst_13 : f32 to vector<8x128xf32>
    %54 = arith.mulf %53, %38 : vector<8x128xf32>
    %55 = vector.broadcast %45 : vector<8x1xf32> to vector<8x128xf32>
    %56 = vector.broadcast %52 : vector<1x128xf32> to vector<8x128xf32>
    %57 = arith.addf %55, %56 : vector<8x128xf32>
    %58 = arith.subf %57, %38 : vector<8x128xf32>
    %59 = arith.cmpf ogt, %54, %58 : vector<8x128xf32>
    %60 = vector.broadcast %10 : vector<8x1xf32> to vector<8x128xf32>
    %61 = vector.broadcast %15 : vector<1x128xf32> to vector<8x128xf32>
    %62 = arith.cmpf oeq, %60, %61 : vector<8x128xf32>
    %63 = arith.andi %59, %62 : vector<8x128xi1>
    %64 = tpu.iota {dimensions = array<i32: 1>} : vector<8x128xi32>
    %c129_i32 = arith.constant 129 : i32
    %65 = vector.broadcast %c129_i32 : i32 to vector<8x128xi32>
    %66 = arith.select %63, %64, %65 : vector<8x128xi1>, vector<8x128xi32>
    %cst_14 = arith.constant dense<2147483647> : vector<8xi32>
    %67 = vector.multi_reduction <minsi>, %66, %cst_14 [1] : vector<8x128xi32> to vector<8xi32>
    %68 = vector.shape_cast %67 : vector<8xi32> to vector<8x1xi32>
    %69 = vector.broadcast %68 : vector<8x1xi32> to vector<8x128xi32>
    %70 = arith.cmpi eq, %64, %69 : vector<8x128xi32>
    %71 = arith.extui %70 : vector<8x128xi1> to vector<8x128xi32>
    %72 = arith.sitofp %71 : vector<8x128xi32> to vector<8x128xf32>
    %cst_15 = arith.constant dense<0.000000e+00> : vector<8x8xf32>
    %73 = tpu.matmul %72, %5, %cst_15 {dimension_numbers = #tpu.dot_dimension_numbers<[1], [0], [0], [1], [0, 0, 1, 1], [], []>} : vector<8x128xf32>, vector<128x8xf32>, vector<8x8xf32> -> vector<8x8xf32>
    %c0_16 = arith.constant 0 : index
    %c0_17 = arith.constant 0 : index
    %74 = vector.load %arg6[%c0_16, %c0_17] : memref<8x8xf32, #tpu.memory_space<vmem>>, vector<8x8xf32>
    %75 = vector.extract_strided_slice %73 {offsets = [0, 4], sizes = [8, 1], strides = [1, 1]} : vector<8x8xf32> to vector<8x1xf32>
    %cst_18 = arith.constant 5.000000e-01 : f32
    %76 = vector.broadcast %cst_18 : f32 to vector<8x1xf32>
    %77 = arith.cmpf ogt, %75, %76 : vector<8x1xf32>
    %78 = vector.extract_strided_slice %74 {offsets = [0, 4], sizes = [8, 1], strides = [1, 1]} : vector<8x8xf32> to vector<8x1xf32>
    %cst_19 = arith.constant 5.000000e-01 : f32
    %79 = vector.broadcast %cst_19 : f32 to vector<8x1xf32>
    %80 = arith.cmpf olt, %78, %79 : vector<8x1xf32>
    %81 = arith.andi %77, %80 : vector<8x1xi1>
    %82 = vector.shape_cast %81 : vector<8x1xi1> to vector<8x1xi1>
    %83 = vector.broadcast %82 : vector<8x1xi1> to vector<8x8xi1>
    %84 = arith.select %83, %73, %74 : vector<8x8xi1>, vector<8x8xf32>
    %c0_20 = arith.constant 0 : index
    %c0_21 = arith.constant 0 : index
    %85 = vector.load %arg6[%c0_20, %c0_21] : memref<8x8xf32, #tpu.memory_space<vmem>>, vector<8x8xf32>
    tpu.vector_store %arg6[%c0_20, %c0_21], %84 {strides = array<i32>} : memref<8x8xf32, #tpu.memory_space<vmem>>, vector<8x8xf32>,
    %c0_i32_22 = arith.constant 0 : i32
    %86 = arith.cmpi eq, %arg1, %c0_i32_22 : i32
    %87 = arith.extui %86 : i1 to i32
    %c0_i32_23 = arith.constant 0 : i32
    %88 = arith.cmpi ne, %87, %c0_i32_23 : i32
    scf.if %88 {
      %c0_24 = arith.constant 0 : index
      %c0_25 = arith.constant 0 : index
      %89 = vector.load %arg6[%c0_24, %c0_25] : memref<8x8xf32, #tpu.memory_space<vmem>>, vector<8x8xf32>
      %90 = tpu.iota {dimensions = array<i32: 1>} : vector<8x8xi32>
      %c4_i32 = arith.constant 4 : i32
      %91 = vector.broadcast %c4_i32 : i32 to vector<8x8xi32>
      %92 = arith.cmpi slt, %90, %91 : vector<8x8xi32>
      %93 = arith.subf %3, %89 : vector<8x8xf32>
      %cst_26 = arith.constant 0.000000e+00 : f32
      %94 = vector.broadcast %cst_26 : f32 to vector<8x8xf32>
      %95 = arith.select %92, %93, %94 : vector<8x8xi1>, vector<8x8xf32>
      %96 = math.absf %95 : vector<8x8xf32>
      %cst_27 = arith.constant 1.000000e+00 : f32
      %97 = vector.broadcast %cst_27 : f32 to vector<8x8xf32>
      %98 = arith.cmpf olt, %96, %97 : vector<8x8xf32>
      %cst_28 = arith.constant 5.000000e-01 : f32
      %99 = vector.broadcast %cst_28 : f32 to vector<8x8xf32>
      %100 = arith.mulf %99, %96 : vector<8x8xf32>
      %101 = arith.mulf %100, %96 : vector<8x8xf32>
      %cst_29 = arith.constant 5.000000e-01 : f32
      %102 = vector.broadcast %cst_29 : f32 to vector<8x8xf32>
      %103 = arith.subf %96, %102 : vector<8x8xf32>
      %104 = arith.select %98, %101, %103 : vector<8x8xi1>, vector<8x8xf32>
      %cst_30 = arith.constant dense<0.000000e+00> : vector<8xf32>
      %105 = vector.multi_reduction <add>, %104, %cst_30 [1] : vector<8x8xf32> to vector<8xf32>
      %106 = vector.shape_cast %105 : vector<8xf32> to vector<8x1xf32>
      %cst_31 = arith.constant 2.500000e-01 : f32
      %107 = vector.broadcast %cst_31 : f32 to vector<8x1xf32>
      %108 = arith.mulf %106, %107 : vector<8x1xf32>
      %109 = vector.extract_strided_slice %3 {offsets = [0, 4], sizes = [8, 1], strides = [1, 1]} : vector<8x8xf32> to vector<8x1xf32>
      %110 = vector.extract_strided_slice %89 {offsets = [0, 4], sizes = [8, 1], strides = [1, 1]} : vector<8x8xf32> to vector<8x1xf32>
      %cst_32 = arith.constant 5.000000e-01 : f32
      %111 = vector.broadcast %cst_32 : f32 to vector<8x1xf32>
      %112 = arith.cmpf ogt, %110, %111 : vector<8x1xf32>
      %113 = math.log %109 : vector<8x1xf32>
      %114 = arith.subf %108, %113 : vector<8x1xf32>
      %cst_33 = arith.constant 1.000000e+00 : f32
      %115 = vector.broadcast %cst_33 : f32 to vector<8x1xf32>
      %116 = arith.subf %115, %109 : vector<8x1xf32>
      %117 = math.log %116 : vector<8x1xf32>
      %cst_34 = arith.constant 0.000000e+00 : f32
      %118 = vector.broadcast %cst_34 : f32 to vector<8x1xf32>
      %119 = arith.subf %118, %117 : vector<8x1xf32>
      %120 = arith.select %112, %114, %119 : vector<8x1xi1>, vector<8x1xf32>
      %121 = tpu.iota {dimensions = array<i32: 0>} : vector<8x1xi32>
      %c8_i32 = arith.constant 8 : i32
      %122 = arith.muli %arg0, %c8_i32 : i32
      %123 = vector.broadcast %122 : i32 to vector<8x1xi32>
      %124 = arith.addi %123, %121 : vector<8x1xi32>
      %c6_i32 = arith.constant 6 : i32
      %125 = vector.broadcast %c6_i32 : i32 to vector<8x1xi32>
      %126 = arith.cmpi slt, %124, %125 : vector<8x1xi32>
      %cst_35 = arith.constant 0.000000e+00 : f32
      %127 = vector.broadcast %cst_35 : f32 to vector<8x1xf32>
      %128 = arith.select %126, %120, %127 : vector<8x1xi1>, vector<8x1xf32>
      %129 = vector.shape_cast %128 : vector<8x1xf32> to vector<1x8x1xf32>
      %cst_36 = arith.constant dense<0.000000e+00> : vector<1xf32>
      %130 = vector.multi_reduction <add>, %129, %cst_36 [1, 2] : vector<1x8x1xf32> to vector<1xf32>
      %131 = vector.shape_cast %130 : vector<1xf32> to vector<1x1x1xf32>
      %132 = vector.extract %131[0, 0, 0] : f32 from vector<1x1x1xf32>
      %133 = vector.broadcast %132 : f32 to vector<1x8x128xf32>
      %c0_37 = arith.constant 0 : index
      %c0_38 = arith.constant 0 : index
      %c0_39 = arith.constant 0 : index
      %134 = vector.load %arg5[%c0_37, %c0_38, %c0_39] : memref<1x8x128xf32, #tpu.memory_space<vmem>>, vector<1x8x128xf32>
      tpu.vector_store %arg5[%c0_37, %c0_38, %c0_39], %133 {strides = array<i32>} : memref<1x8x128xf32, #tpu.memory_space<vmem>>, vector<1x8x128xf32>,
    } else {
    }
    return
  }
  func.func @transform_0(%arg0: i32, %arg1: i32) -> (i32, i32) {
    %c0_i32 = arith.constant 0 : i32
    %c0_i32_0 = arith.constant 0 : i32
    return %arg0, %c0_i32 : i32, i32
  }
  func.func @transform_1(%arg0: i32, %arg1: i32) -> (i32, i32) {
    %c0_i32 = arith.constant 0 : i32
    %c0_i32_0 = arith.constant 0 : i32
    return %c0_i32, %arg1 : i32, i32
  }
  func.func @transform_2(%arg0: i32, %arg1: i32) -> (i32, i32) {
    %c0_i32 = arith.constant 0 : i32
    %c0_i32_0 = arith.constant 0 : i32
    return %arg1, %c0_i32 : i32, i32
  }
  func.func @transform_3(%arg0: i32, %arg1: i32) -> (i32, i32, i32) {
    %c0_i32 = arith.constant 0 : i32
    %c0_i32_0 = arith.constant 0 : i32
    %c0_i32_1 = arith.constant 0 : i32
    return %arg0, %c0_i32, %c0_i32_0 : i32, i32, i32
  }
}

</mosaic_0001>

<bundles_post_ra>
// kernel: tpu_custom_call.1
= control target key start
LH: loop header
LB: loop body
LE: loop exit
PB: predicated region body
PF: predicated region fallthrough
CT: control target
= control target key end

     0   :  { %s395_s14 = smov 2   ;;  %v396_v1 = vmov 0   ;;  %s533_s0 = inlined_call_operand.vmem [shape: f32[8,8], index: 0, kind: input, shape index: {}]   ;;  %s534_s1 = inlined_call_operand.vmem [shape: f32[8,128], index: 1, kind: input, shape index: {}]   ;;  %s535_s2 = inlined_call_operand.vmem [shape: f32[128,8], index: 2, kind: input, shape index: {}]   ;;  %s536_s3 = inlined_call_operand.hbm [shape: f32[1,8,128], index: 3, kind: output, shape index: {}]  }
   0x1   :  { %v431_v0 = vld [vmem:[%s533_s0] sm:$0xff]  ;;  %361 = vset.pattern.permute.xlu1 %v396_v1 }
   0x2   :  { %83 = vrot.lane.b32.xlu0 %v431_v0, %s395_s14 }
   0x3   :  { %8 = vsyncpa [#allocation4], 0  ;;  %41 = vperm.xlu1 %361, %v431_v0   ;;  %v397_v2 = vmov 2   ;;  %v398_v3 = vmov 1   ;;  %v399_v4 = vmov 3   ;;  %s400_s0 = smov 127   ;;  %v44_v11 = vlaneseq }
   0x4   :  { %363 = vset.pattern.permute.xlu0 %v397_v2  ;;  %v401_v8 = vmov 6   ;;  %v22_v19 = vld [vmem:[%s534_s1] sm:$0xff]  ;;  %v38_v54 = vld [vmem:[%s535_s2 + $0x78] sm:$0xff]  ;;  %v402_v55 = vmov 0.0   ;;  %v37_v56 = vld [vmem:[%s535_s2 + $0x70] sm:$0xff]  ;;  %vm403_vm4 = vmmov 0  }
   0x5   :  { %v441_v13 = vshrl.u32 %v44_v11, 7  ;;  %v94_v20 = vrot.slane %v22_v19, 6  ;;  %v451_v50 = vand.u32 127, %v44_v11  ;;  %311 = vmatprep.subr.mxu0 %v402_v55  ;;  %v36_v57 = vld [vmem:[%s535_s2 + $0x68] sm:$0xff]  ;;  %v35_v58 = vld [vmem:[%s535_s2 + $0x60] sm:$0xff]  ;;  %v34_v59 = vld [vmem:[%s535_s2 + $0x58] sm:$0xff]  ;;  %343 = vmatprep.mubr.msk.f32.mxu0 %vm403_vm4, %v402_v55 }
   0x6   :  { %312 = vmatpush3.msra.mxu0 %v38_v54  ;;  %v33_v60 = vld [vmem:[%s535_s2 + $0x50] sm:$0xff]  ;;  %v32_v61 = vld [vmem:[%s535_s2 + $0x48] sm:$0xff]  ;;  %v31_v62 = vld [vmem:[%s535_s2 + $0x40] sm:$0xff]  ;;  %vm19_vm6 = vcmask 64512   ;;  %vm264_vm15 = vcmask 7168   ;;  %s407_s19 = smov [#allocation3]  }
   0x7   :  { %362 = vset.pattern.permute.xlu1 %v398_v3  ;;  %v46_v15 = vsub.s32 0, %v441_v13  ;;  %v55_v16 = vsub.s32 1, %v441_v13  ;;  %v73_v17 = vsub.s32 3, %v441_v13  ;;  %v64_v18 = vsub.s32 2, %v441_v13  ;;  %313 = vmatprep.subr.mxu0 %v402_v55  ;;  %v30_v63 = vld [vmem:[%s535_s2 + $0x38] sm:$0xff]  ;;  %v28_v3 = vld [vmem:[%s535_s2 + $0x28] sm:$0xff] }
   0x8   :  { %50 = vperm.xlu1 %362, %v431_v0   ;;  %v96_v27 = vsub.f32 %v22_v19, %v94_v20  ;;  %v121_v41 = vsub.s32 6, %v441_v13  ;;  %314 = vmatpush3.msra.mxu0 %v37_v56  ;;  %v24_v11 = vld [vmem:[%s535_s2 + $0x8] sm:$0xff]  ;;  %20 = vst.msk [vmem:[#allocation2] sm:$0xff] %vm19_vm6, %v402_v55  ;;  %v405_v20 = vmov 4   ;;  %vm231_vm11 = vcmp.lt.s32.totalorder %v451_v50, 4  ;;  %s283_s20 = sshll.u32 %s407_s19, 4  ;;  %s284_s20 = int_to_ptr.vmem [resolvable:$true] %s283_s20 }
   0x9   :  { %v47_v21 = vrot.slane %v22_v19, %v46_v15  ;;  %v56_v22 = vrot.slane %v22_v19, %v55_v16  ;;  %v74_v23 = vrot.slane %v22_v19, %v73_v17  ;;  %v65_v24 = vrot.slane %v22_v19, %v64_v18  ;;  %315 = vmatprep.subr.mxu0 %v402_v55  ;;  %s373_s22 = scalar_lea.vmem %s284_s20, 128  ;;  %p378_p1 = scmp.lt.s32.totalorder %s284_s20, %s284_s20 }
   0xa   :  { %v97_v32 = vadd.f32 1.0, %v96_v27  ;;  %v122_v44 = vrot.slane %v22_v19, %v121_v41  ;;  %316 = vmatpush3.msra.mxu0 %v36_v57  ;;  %v404_v19 = vmov 1.0   ;;  %vm258_vm13 = vcmp.lt.s32.totalorder %v441_v13, 6  ;;  %p374_p0 = scmp.ne.s32.totalorder %s284_s20, %s373_s22  ;;  %p379_p2 = scmp.lt.s32.totalorder %s373_s22, %s373_s22 }
   0xb   :  { %317 = vmatprep.subr.mxu0 %v402_v55 }
   0xc   :  { %364 = vset.pattern.permute.xlu1 %v399_v4  ;;  %v99_v35 = vrot.slane %v97_v32, 1  ;;  %318 = vmatpush3.msra.mxu0 %v35_v58  ;;  %v27_v4 = vld [vmem:[%s535_s2 + $0x20] sm:$0xff]  ;;  %p380_p3 = por %p379_p2, %p378_p1 }
   0xd   :  { %68 = vperm.xlu1 %364, %v431_v0   ;;  %319 = vmatprep.subr.mxu0 %v402_v55 }
   0xe   :  { %v101_v38 = vmul.f32 %v99_v35, %v97_v32  ;;  %320 = vmatpush3.msra.mxu0 %v34_v59  ;;  %v248_v35 = vsub.f32 1.0, %v431_v0  ;;  %p381_p4 = pnand %p380_p3, %p374_p0 }
   0xf   :  { %321 = vmatprep.subr.mxu0 %v402_v55 }
  0x10   :  { %v111_v42 = vrot.slane %v101_v38, %v64_v18  ;;  %322 = vmatpush3.msra.mxu0 %v33_v60  ;;  %369 = vlog2.f32 %v248_v35 }
  0x11   :  { %365 = vset.pattern.permute.xlu1 %v397_v2  ;;  %323 = vmatprep.subr.mxu0 %v402_v55  ;;  %v29_v2 = vld [vmem:[%s535_s2 + $0x30] sm:$0xff]  ;;  %371 = vlog2.f32 %v431_v0 }
  0x12   :  { %324 = vmatpush3.msra.mxu0 %v32_v61 }
  0x13   :  { %325 = vmatprep.subr.mxu0 %v402_v55 }
  0x14   :  { %326 = vmatpush3.msra.mxu0 %v31_v62 }
  0x15   :  { %327 = vmatprep.subr.mxu0 %v402_v55 }
  0x16   :  { %328 = vmatpush3.msra.mxu0 %v30_v63 }
  0x17   :  { %329 = vmatprep.subr.mxu0 %v402_v55 }
  0x18   :  { %330 = vmatpush3.msra.mxu0 %v29_v2 }
  0x19   :  { %331 = vmatprep.subr.mxu0 %v402_v55 }
  0x1a   :  { %332 = vmatpush3.msra.mxu0 %v28_v3 }
  0x1b   :  { %333 = vmatprep.subr.mxu0 %v402_v55 }
  0x1c   :  { %334 = vmatpush3.msra.mxu0 %v27_v4 }
  0x1d   :  { %335 = vmatprep.subr.mxu0 %v402_v55 }
  0x74   :  { %v84_v5 = vpop.permute.xlu0 %83 }
  0x75   :  { %v86_v6 = vsub.f32 %v431_v0, %v84_v5  ;;  %v26_v5 = vld [vmem:[%s535_s2 + $0x18] sm:$0xff] }
  0x76   :  { %336 = vmatpush3.msra.mxu0 %v26_v5 }
  0x77   :  { %v87_v7 = vadd.f32 1.0, %v86_v6  ;;  %337 = vmatprep.subr.mxu0 %v402_v55 }
  0x79   :  { %89 = vrot.lane.b32.xlu0 %v87_v7, %s400_s0 }
  0x7d   :  { %59 = vperm.xlu0 %363, %v431_v0  }
  0x7e   :  { %v42_v12 = vpop.permute.xlu1 %41 }
  0x7f   :  { %v48_v28 = vmax.f32 %v42_v12, %v47_v21  ;;  %v23_v12 = vld [vmem:[%s535_s2] sm:$0xff] }
  0x80   :  { %v215_v21 = vld [vmem:[#allocation2] sm:$0xff] }
  0x81   :  { %366 = vset.pattern.permute.xlu0 %v401_v8  ;;  %vm217_vm7 = vcmp.lt.f32.partialorder %v215_v21, 0.5 }
  0x82   :  { %116 = vperm.xlu0 %366, %v431_v0  }
  0x83   :  { %v51_v14 = vpop.permute.xlu1 %50 }
  0x84   :  { %v57_v29 = vmax.f32 %v51_v14, %v56_v22 }
  0x86   :  { %368 = vset.pattern.permute.xlu0 %v405_v20 }
  0x88   :  { %v69_v25 = vpop.permute.xlu1 %68 }
  0x89   :  { %v75_v30 = vmin.f32 %v69_v25, %v74_v23 }
  0x8b   :  { %v79_v33 = vsub.f32 %v75_v30, %v57_v29 }
  0x8d   :  { %v80_v36 = vadd.f32 1.0, %v79_v33 }
  0x8f   :  { %v81_v39 = vmax.f32 %v80_v36, 0.0  ;;  %v370_v36 = vpop.eup %369 }
  0x90   :  { %v250_v38 = vmul.f32 0.6931472, %v370_v36 }
  0xeb   :  { %v90_v9 = vpop.permute.xlu0 %89 }
  0xec   :  { %v92_v10 = vmul.f32 %v90_v9, %v87_v7 }
  0xee   :  { %105 = vperm.xlu1 %365, %v92_v10   ;;  %v25_v10 = vld [vmem:[%s535_s2 + $0x10] sm:$0xff]  ;;  %s406_s2 = smov 124  }
  0xef   :  { %338 = vmatpush3.msra.mxu0 %v25_v10 }
  0xf0   :  { %339 = vmatprep.subr.mxu0 %v402_v55 }
  0xf1   :  { %340 = vmatpush3.msra.mxu0 %v24_v11 }
  0xf2   :  { %341 = vmatprep.subr.mxu0 %v402_v55  ;;  %367 = vset.pattern.permute.xlu1 %v405_v20 }
  0xf3   :  { %342 = vmatpush3.msra.mxu0 %v23_v12 }
  0xf8   :  { %v60_v26 = vpop.permute.xlu0 %59 }
  0xf9   :  { %v66_v31 = vmin.f32 %v60_v26, %v65_v24 }
  0xfb   :  { %v76_v34 = vsub.f32 %v66_v31, %v48_v28 }
  0xfd   :  { %v77_v37 = vadd.f32 1.0, %v76_v34  ;;  %v117_v46 = vpop.permute.xlu0 %116 }
  0xfe   :  { %vm123_vm0 = vcmp.eq.f32.partialorder %v117_v46, %v122_v44 }
  0xff   :  { %v78_v40 = vmax.f32 %v77_v37, 0.0  ;;  %v372_v37 = vpop.eup %371 }
 0x101   :  { %v82_v43 = vmul.f32 %v81_v39, %v78_v40  ;;  %v246_v39 = vmul.f32 0.6931472, %v372_v37 }
 0x103   :  { %v102_v49 = vmul.f32 2.0, %v82_v43 }
 0x169   :  { %v106_v45 = vpop.permute.xlu1 %105 }
 0x16a   :  { %v112_v47 = vadd.f32 %v111_v42, %v106_v45  ;;  %v251_v42 = vsub.f32 0.0, %v250_v38 }
 0x16c   :  { %v113_v48 = vsub.f32 %v112_v47, %v82_v43 }
 0x16e   :  { %vm114_vm1 = vcmp.gt.f32.partialorder %v102_v49, %v113_v48 }
 0x16f   :  { %vm124_vm2 = vmand %vm114_vm1, %vm123_vm0 }
 0x170   :  { %v127_v51 = vsel %vm124_vm2, %v451_v50, 129 }
 0x171   :  { %v129_v52 = vshra.s32 %v127_v51, 16  ;;  %v128_v6 = vand.u32 65535, %v127_v51 }
 0x173   :  { %v131_v53 = vcvt.s32.f32 %v129_v52  ;;  %v130_v8 = vcvt.s32.f32 %v128_v6 }
 0x175   :  { %132 = vmin.xlane.f32.xlu1 %v131_v53 }
 0x1fe   :  { %v133_v7 = vpop.xlane.xlu1 %132 }
 0x1ff   :  { %vm134_vm3 = vcmp.eq.f32.partialorder %v131_v53, %v133_v7  ;;  %v139_v14 = vcvt.f32.s32 %v133_v7 }
 0x200   :  { %v135_v9 = vsel %vm134_vm3, %v130_v8, inf }
 0x201   :  { %136 = vmin.xlane.f32.xlu0 %v135_v9  ;;  %v140_v16 = vshll.u32 %v139_v14, 16 }
 0x28a   :  { %v137_v15 = vpop.xlane.xlu0 %136 }
 0x28b   :  { %v138_v17 = vcvt.f32.s32 %v137_v15 }
 0x28d   :  { %v141_v18 = vadd.s32 %v140_v16, %v138_v17 }
 0x28f   :  { %vm142_vm5 = vcmp.eq.s32.totalorder %v451_v50, %v141_v18 }
 0x290   :  { %344 = vmatmul.mubr.msk.f32.vlgmr.msra.gmra.mxu0 %vm142_vm5, %v404_v19 }
 0x350   :  { %v211_v22 = vpop.f32.mrf.mxu0 }
 0x351   :  { %vm216_vm8 = vcmp.gt.f32.partialorder %v211_v22, 0.5 }
 0x352   :  { %v345_v23 = vpop.f32.mrf.mxu0  ;;  %vm218_vm9 = vmand %vm216_vm8, %vm217_vm7 }
 0x353   :  { %v219_v24 = vsel %vm218_vm9, 1, %v396_v1 }
 0x354   :  { %221 = vperm.xlu1 %367, %v219_v24  }
 0x3cf   :  { %v222_v25 = vpop.permute.xlu1 %221 }
 0x3d0   :  { %vm223_vm10 = vcmp.eq.s32.totalorder %v222_v25, 1 }
 0x3d1   :  { %v224_v26 = vsel %vm223_vm10, %v211_v22, %v215_v21 }
 0x3d2   :  { %226 = vst.msk [vmem:[#allocation2] sm:$0xff] %vm19_vm6, %v224_v26 }
 0x3d9   :  { %v230_v27 = vld [vmem:[#allocation2] sm:$0xff] }
 0x3da   :  { %v232_v28 = vsub.f32 %v431_v0, %v230_v27  ;;  %vm244_vm14 = vcmp.gt.f32.partialorder %v230_v27, 0.5 }
 0x3dc   :  { %v233_v29 = vsel %vm231_vm11, %v232_v28, 0.0 }
 0x3dd   :  { %v234_v30 = vand.u32 2147483647, %v233_v29 }
 0x3df   :  { %v236_v31 = vmul.f32 0.5, %v234_v30  ;;  %v293_v33 = vadd.f32 -0.5, %v234_v30  ;;  %vm235_vm12 = vcmp.lt.f32.partialorder %v234_v30, 1.0 }
 0x3e1   :  { %v237_v32 = vmul.f32 %v236_v31, %v234_v30 }
 0x3e3   :  { %v239_v34 = vsel %vm235_vm12, %v237_v32, %v293_v33 }
 0x3e4   :  { %v240_v1 = vsel %vm19_vm6, %v239_v34, 0.0 }
 0x3e5   :  { %241 = vadd.xlane.f32.xlu0 %v240_v1 }
 0x46e   :  { %v242_v40 = vpop.xlane.xlu0 %241 }
 0x46f   :  { %v243_v41 = vmul.f32 0.25, %v242_v40 }
 0x471   :  { %v247_v43 = vsub.f32 %v243_v41, %v246_v39 }
 0x473   :  { %v252_v44 = vsel %vm244_vm14, %v247_v43, %v251_v42 }
 0x474   :  { %v259_v45 = vsel %vm258_vm13, %v252_v44, 0.0 }
 0x475   :  { %261 = vrot.lane.b32.xlu0 %v259_v45, %s406_s2 }
 0x4e7   :  { %v262_v46 = vpop.permute.xlu0 %261 }
 0x4e8   :  { %v265_v47 = vsel %vm264_vm15, %v262_v46, 0.0 }
 0x4e9   :  { %266 = vadd.xlane.f32.xlu1 %v265_v47 }
 0x572   :  { %v267_v0 = vpop.xlane.xlu1 %266 }
 0x573   :  { %v268_v48 = vrot.slane %v267_v0, 4 }
 0x575   :  { %v269_v49 = vadd.f32 %v268_v48, %v267_v0 }
 0x577   :  { %v270_v50 = vrot.slane %v269_v49, 2 }
 0x579   :  { %v271_v51 = vadd.f32 %v270_v50, %v269_v49 }
 0x57b   :  { %v272_v52 = vrot.slane %v271_v51, 1 }
 0x57d   :  { %v273_v53 = vadd.f32 %v272_v52, %v271_v51 }
 0x57f   :  { %346 = vpush %v273_v53 }
 0x5b0   :  { %s347_s21 = spop %346 }
 0x5b1   :  { %v275_v13 = vstv %s347_s21 }
 0x5b2   :  { %276 = vst [vmem:[#allocation3] sm:$0xff] %v275_v13 }
 0x5b3   :  { %384 = shalt.err (!%p381_p4)
}
 0x5b4   :  { %286 = dma.vmem_to_hbm [thread:$0]  %s284_s20, 128, %s536_s3, [#allocation4]  }
 0x5b5   :  { %393 = dma.done.wait [#allocation4], 128  }
 0x5b6   :  { %394 = vsyncadd [#allocation4], 4294967168 }
 0x5b7   :  { %290 = vsyncpa [#allocation4], 1 }

</bundles_post_ra>
